<compile_context>
chip_gen: v7x
topology: tpu7x:2x2x1
jax: 0.10.0
libtpu: 0.0.40
codegen_flags: <defaults>
</compile_context>

<pallas_src>
import jax
import jax.numpy as jnp
import numpy as np
from jax.experimental import pallas as pl
from jax.experimental.pallas import tpu as pltpu


# ----------------------------- Pallas kernel ------------------------------- #
def _make_branch_kernel(cin, h2, w2, num_classes):
    """Fused stem-conv + global-avg-pool + dual-head kernel (closure over statics)."""

    def kernel(planes_ref, ecol_ref, w_ref, b_ref, o_ref):
        # planes_ref : (TN, 4*Cin, H2*W2) bf16  parity planes, spatial flattened (lane-dense)
        #              channel = (2*row_parity + col_parity)*Cin + c
        # ecol_ref   : (TN, 2*Cin, H2)    bf16  last image column split by row parity
        # w_ref      : (9*Cin, OUT)       f32   conv∘heads fold, pre-scaled by 1/(Ho*Wo)
        # b_ref      : (1, OUT)           f32   fused bias row [b_cls | b_reg | 0...]
        # o_ref      : (TN, OUT)          f32   lane-dense output slab

        # --- 4 full parity-plane sums + 2 last-row sums (bf16 -> f32 accumulation,
        #     sliced straight from the ref: live set stays per-plane-sized).
        s = {}
        lastrow = {}
        for a in (0, 1):
            for b in (0, 1):
                ch = (2 * a + b) * cin
                v = planes_ref[:, ch:ch + cin, :]                       # (TN, Cin, H2*W2) bf16
                s[(a, b)] = jnp.sum(v, axis=-1, dtype=jnp.float32)      # (TN, Cin) f32
                if a == 1:
                    # last plane row == contiguous final W2 lanes of the flattened plane
                    lastrow[b] = jnp.sum(v[:, :, (h2 - 1) * w2:], axis=-1,
                                         dtype=jnp.float32)

        # --- 2 last-column sums + corner, from the tiny edge-column input.
        lastcol = {}
        corner = None
        for a in (0, 1):
            e = ecol_ref[:, a * cin:(a + 1) * cin, :]                   # (TN, Cin, H2) bf16
            lastcol[a] = jnp.sum(e, axis=-1, dtype=jnp.float32)
            if a == 1:
                corner = e[:, :, h2 - 1].astype(jnp.float32)            # x[.., H-1, W-1]

        # --- inclusion-exclusion: 9 tap-region sums, ordered t = i*3 + j
        #     (matching the (i, j, c) row ordering of the folded weight).
        taps = [
            s[(1, 1)] - lastrow[1] - lastcol[1] + corner,   # (i,j)=(0,0)
            s[(1, 0)] - lastrow[0],                         # (0,1)
            s[(1, 1)] - lastrow[1],                         # (0,2)
            s[(0, 1)] - lastcol[0],                         # (1,0)
            s[(0, 0)],                                      # (1,1)
            s[(0, 1)],                                      # (1,2)
            s[(1, 1)] - lastcol[1],                         # (2,0)
            s[(1, 0)],                                      # (2,1)
            s[(1, 1)],                                      # (2,2)
        ]
        ap = jnp.concatenate(taps, axis=-1)                 # (TN, 9*Cin) f32, register-resident

        # --- single MXU GEMM: conv, pool scale and both linear heads folded in w_ref.
        logits = jnp.dot(ap, w_ref[...], preferred_element_type=jnp.float32) + b_ref[...]

        # sigmoid only on the regression column (column index == num_classes).
        col = jax.lax.broadcasted_iota(jnp.int32, logits.shape, 1)
        o_ref[...] = jnp.where(col == num_classes, jax.nn.sigmoid(logits), logits)

    return kernel


# ------------------------------ JAX wrapper -------------------------------- #
def custom_branch_forward(x_nchw, params, *, batch_tile=32):
    """Forward pass of CustomBranch (simplified backbone), heavy compute in Pallas."""
    w_conv = params['conv_w']                        # (C_stem, Cin, 3, 3) OIHW
    w_cls, b_cls = params['cls_w'], params['cls_b']  # (num_classes, C_stem), (num_classes,)
    w_reg, b_reg = params['reg_w'], params['reg_b']  # (1, C_stem), (1,)

    N, Cin, H, W = x_nchw.shape
    assert H % 2 == 0 and W % 2 == 0, "stride-2 parity-plane layout assumes even H, W"
    C_stem = w_conv.shape[0]
    num_classes = w_cls.shape[0]
    H2, W2 = H // 2, W // 2                          # == conv output dims (Ho, Wo)
    out_lanes = max(128, ((num_classes + 1 + 127) // 128) * 128)   # lane-dense output

    # ---- input glue: cast to bf16 FIRST, then space-to-depth parity planes with
    #      spatial flattened into the lane axis.  No explicit zero-pad (padding
    #      contributes nothing to the pooled tap sums).
    x_bf = x_nchw.astype(jnp.bfloat16)
    xq = x_bf.reshape(N, Cin, H2, 2, W2, 2)          # (N, c, u, a, v, b)
    xq = jnp.transpose(xq, (0, 3, 5, 1, 2, 4))       # (N, a, b, c, u, v)
    planes = xq.reshape(N, 4 * Cin, H2 * W2)         # channel = (2a+b)*Cin + c

    # last image column split by row parity -> needed for the two "minus last
    # column" corrections (avoids strided lane access in the kernel); tiny.
    ec = x_bf[:, :, :, W - 1].reshape(N, Cin, H2, 2)  # (N, c, u, a)
    ecol = jnp.transpose(ec, (0, 3, 1, 2)).reshape(N, 2 * Cin, H2)

    # ---- weight glue: fold stem conv + both linear heads + 1/(Ho*Wo) into one
    #      f32 matrix (tiny; kept f32 for numerics).  Valid because there is no
    #      bias/BN/activation between the conv and the pool.
    w_conv_gemm = jnp.transpose(w_conv, (2, 3, 1, 0)).reshape(9 * Cin, C_stem)
    w_head = jnp.concatenate([w_cls.T, w_reg.T], axis=1)          # (C_stem, nc+1)
    w_fold = (w_conv_gemm.astype(jnp.float32) @ w_head.astype(jnp.float32))
    w_fold = w_fold * (1.0 / float(H2 * W2))                      # fold avg-pool scale
    w_fold_p = jnp.zeros((9 * Cin, out_lanes), jnp.float32)
    w_fold_p = w_fold_p.at[:, :num_classes + 1].set(w_fold)
    bias_p = jnp.zeros((1, out_lanes), jnp.float32)
    bias_p = bias_p.at[0, :num_classes].set(b_cls).at[0, num_classes].set(b_reg[0])

    tn = min(batch_tile, N)
    kernel = _make_branch_kernel(Cin, H2, W2, num_classes)

    out = pl.pallas_call(
        kernel,
        out_shape=jax.ShapeDtypeStruct((N, out_lanes), jnp.float32),
        grid=(pl.cdiv(N, tn),),
        in_specs=[
            pl.BlockSpec((tn, 4 * Cin, H2 * W2), lambda i: (i, 0, 0)),
            pl.BlockSpec((tn, 2 * Cin, H2), lambda i: (i, 0, 0)),
            pl.BlockSpec((9 * Cin, out_lanes), lambda i: (0, 0)),
            pl.BlockSpec((1, out_lanes), lambda i: (0, 0)),
        ],
        out_specs=pl.BlockSpec((tn, out_lanes), lambda i: (i, 0)),
        compiler_params=pltpu.CompilerParams(
            # v7x: shard the batch grid over the 2 TensorCores (no-op on v5e/v6e).
            # For very large tn on big images, also set vmem_limit_bytes here.
            dimension_semantics=("parallel",)),
    )(planes, ecol, w_fold_p, bias_p)

    cls_out = out[:, :num_classes]
    reg_out = out[:, num_classes:num_classes + 1]
    return cls_out, reg_out


# ------------------------------ reference ---------------------------------- #
def _reference_forward(x_nchw, params):
    x_nhwc = jnp.transpose(x_nchw, (0, 2, 3, 1)).astype(jnp.float32)
    w_hwio = jnp.transpose(params['conv_w'], (2, 3, 1, 0))
    conv = jax.lax.conv_general_dilated(
        x_nhwc, w_hwio, window_strides=(2, 2), padding=((1, 1), (1, 1)),
        dimension_numbers=('NHWC', 'HWIO', 'NHWC'))
    feat = jnp.mean(conv, axis=(1, 2))                            # global avg pool + flatten
    cls = feat @ params['cls_w'].T + params['cls_b']
    reg = jax.nn.sigmoid(feat @ params['reg_w'].T + params['reg_b'])
    return cls, reg


# --------------------------------- main ------------------------------------ #
if __name__ == "__main__":
    N, Cin, H, W = 2, 4, 16, 16
    C_stem = 32            # MobileNetV2-style replaced stem conv
    num_classes = 5
    num_ftrs = C_stem      # simplified backbone -> features = stem channels

    key = jax.random.PRNGKey(0)
    k_conv, k_cw, k_cb, k_rw, k_rb, k_x = jax.random.split(key, 6)

    params = {
        'conv_w': 0.1 * jax.random.normal(k_conv, (C_stem, Cin, 3, 3), jnp.float32),
        'cls_w': 0.1 * jax.random.normal(k_cw, (num_classes, num_ftrs), jnp.float32),
        'cls_b': 0.1 * jax.random.normal(k_cb, (num_classes,), jnp.float32),
        'reg_w': 0.1 * jax.random.normal(k_rw, (1, num_ftrs), jnp.float32),
        'reg_b': 0.1 * jax.random.normal(k_rb, (1,), jnp.float32),
    }
    x = jax.random.normal(k_x, (N, Cin, H, W), jnp.float32)   # NCHW (PyTorch convention)

    cls_out, reg_out = custom_branch_forward(x, params)
    jax.block_until_ready((cls_out, reg_out))

    ref_cls, ref_reg = _reference_forward(x, params)
    assert cls_out.shape == (N, num_classes) and reg_out.shape == (N, 1)
    # Only one quantization step now (bf16 input stream); folded weight, pooled
    # features and GEMM all stay f32.
    np.testing.assert_allclose(np.asarray(cls_out), np.asarray(ref_cls),
                               rtol=1e-2, atol=1e-2)
    np.testing.assert_allclose(np.asarray(reg_out), np.asarray(ref_reg),
                               rtol=1e-2, atol=1e-2)
    print("KERNEL_OK")
</pallas_src>

<mosaic_0001>
module attributes {stable_mosaic.version = 11 : i64} {
  func.func @kernel(%arg0: i32, %arg1: memref<2x16x64xbf16, #tpu.memory_space<vmem>>, %arg2: memref<2x8x8xbf16, #tpu.memory_space<vmem>>, %arg3: memref<36x128xf32, #tpu.memory_space<vmem>>, %arg4: memref<1x128xf32, #tpu.memory_space<vmem>>, %arg5: memref<2x128xf32, #tpu.memory_space<vmem>>) attributes {dimension_semantics = [#tpu.dimension_semantics<parallel>], iteration_bounds = array<i64: 1>, scalar_prefetch = 0 : i64, scratch_operands = 0 : i64, tpu.core_type = #tpu.core_type<tc>, window_params = [{transform_indices = @transform_0, window_bounds = array<i64: 2, 16, 64>}, {transform_indices = @transform_1, window_bounds = array<i64: 2, 8, 8>}, {pipeline_mode = #tpu.pipeline_mode<synchronous>, transform_indices = @transform_2, window_bounds = array<i64: 36, 128>}, {pipeline_mode = #tpu.pipeline_mode<synchronous>, transform_indices = @transform_3, window_bounds = array<i64: 1, 128>}, {transform_indices = @transform_4, window_bounds = array<i64: 2, 128>}]} {
    %c0 = arith.constant 0 : index
    %c0_0 = arith.constant 0 : index
    %c0_1 = arith.constant 0 : index
    %0 = vector.load %arg1[%c0, %c0_0, %c0_1] : memref<2x16x64xbf16, #tpu.memory_space<vmem>>, vector<2x4x64xbf16>
    %1 = arith.extf %0 : vector<2x4x64xbf16> to vector<2x4x64xf32>
    %cst = arith.constant dense<0.000000e+00> : vector<2x4xf32>
    %2 = vector.multi_reduction <add>, %1, %cst [2] : vector<2x4x64xf32> to vector<2x4xf32>
    %c0_2 = arith.constant 0 : index
    %c4 = arith.constant 4 : index
    %c0_3 = arith.constant 0 : index
    %3 = vector.load %arg1[%c0_2, %c4, %c0_3] : memref<2x16x64xbf16, #tpu.memory_space<vmem>>, vector<2x4x64xbf16>
    %4 = arith.extf %3 : vector<2x4x64xbf16> to vector<2x4x64xf32>
    %cst_4 = arith.constant dense<0.000000e+00> : vector<2x4xf32>
    %5 = vector.multi_reduction <add>, %4, %cst_4 [2] : vector<2x4x64xf32> to vector<2x4xf32>
    %c0_5 = arith.constant 0 : index
    %c8 = arith.constant 8 : index
    %c0_6 = arith.constant 0 : index
    %6 = vector.load %arg1[%c0_5, %c8, %c0_6] : memref<2x16x64xbf16, #tpu.memory_space<vmem>>, vector<2x4x64xbf16>
    %7 = arith.extf %6 : vector<2x4x64xbf16> to vector<2x4x64xf32>
    %cst_7 = arith.constant dense<0.000000e+00> : vector<2x4xf32>
    %8 = vector.multi_reduction <add>, %7, %cst_7 [2] : vector<2x4x64xf32> to vector<2x4xf32>
    %9 = vector.extract_strided_slice %6 {offsets = [0, 0, 56], sizes = [2, 4, 8], strides = [1, 1, 1]} : vector<2x4x64xbf16> to vector<2x4x8xbf16>
    %10 = arith.extf %9 : vector<2x4x8xbf16> to vector<2x4x8xf32>
    %cst_8 = arith.constant dense<0.000000e+00> : vector<2x4xf32>
    %11 = vector.multi_reduction <add>, %10, %cst_8 [2] : vector<2x4x8xf32> to vector<2x4xf32>
    %c0_9 = arith.constant 0 : index
    %c12 = arith.constant 12 : index
    %c0_10 = arith.constant 0 : index
    %12 = vector.load %arg1[%c0_9, %c12, %c0_10] : memref<2x16x64xbf16, #tpu.memory_space<vmem>>, vector<2x4x64xbf16>
    %13 = arith.extf %12 : vector<2x4x64xbf16> to vector<2x4x64xf32>
    %cst_11 = arith.constant dense<0.000000e+00> : vector<2x4xf32>
    %14 = vector.multi_reduction <add>, %13, %cst_11 [2] : vector<2x4x64xf32> to vector<2x4xf32>
    %15 = vector.extract_strided_slice %12 {offsets = [0, 0, 56], sizes = [2, 4, 8], strides = [1, 1, 1]} : vector<2x4x64xbf16> to vector<2x4x8xbf16>
    %16 = arith.extf %15 : vector<2x4x8xbf16> to vector<2x4x8xf32>
    %cst_12 = arith.constant dense<0.000000e+00> : vector<2x4xf32>
    %17 = vector.multi_reduction <add>, %16, %cst_12 [2] : vector<2x4x8xf32> to vector<2x4xf32>
    %c0_13 = arith.constant 0 : index
    %c0_14 = arith.constant 0 : index
    %c0_15 = arith.constant 0 : index
    %18 = vector.load %arg2[%c0_13, %c0_14, %c0_15] : memref<2x8x8xbf16, #tpu.memory_space<vmem>>, vector<2x4x8xbf16>
    %19 = arith.extf %18 : vector<2x4x8xbf16> to vector<2x4x8xf32>
    %cst_16 = arith.constant dense<0.000000e+00> : vector<2x4xf32>
    %20 = vector.multi_reduction <add>, %19, %cst_16 [2] : vector<2x4x8xf32> to vector<2x4xf32>
    %c0_17 = arith.constant 0 : index
    %c4_18 = arith.constant 4 : index
    %c0_19 = arith.constant 0 : index
    %21 = vector.load %arg2[%c0_17, %c4_18, %c0_19] : memref<2x8x8xbf16, #tpu.memory_space<vmem>>, vector<2x4x8xbf16>
    %22 = arith.extf %21 : vector<2x4x8xbf16> to vector<2x4x8xf32>
    %cst_20 = arith.constant dense<0.000000e+00> : vector<2x4xf32>
    %23 = vector.multi_reduction <add>, %22, %cst_20 [2] : vector<2x4x8xf32> to vector<2x4xf32>
    %24 = vector.extract_strided_slice %21 {offsets = [0, 0, 7], sizes = [2, 4, 1], strides = [1, 1, 1]} : vector<2x4x8xbf16> to vector<2x4x1xbf16>
    %25 = vector.shape_cast %24 : vector<2x4x1xbf16> to vector<2x4xbf16>
    %26 = arith.extf %25 : vector<2x4xbf16> to vector<2x4xf32>
    %27 = arith.subf %14, %17 : vector<2x4xf32>
    %28 = arith.subf %27, %23 : vector<2x4xf32>
    %29 = arith.addf %28, %26 : vector<2x4xf32>
    %30 = arith.subf %8, %11 : vector<2x4xf32>
    %31 = arith.subf %14, %17 : vector<2x4xf32>
    %32 = arith.subf %5, %20 : vector<2x4xf32>
    %33 = arith.subf %14, %23 : vector<2x4xf32>
    %34 = tpu.concatenate %29, %30, %31, %32, %2, %5, %33, %8, %14 in 1 : vector<2x4xf32>, vector<2x4xf32>, vector<2x4xf32>, vector<2x4xf32>, vector<2x4xf32>, vector<2x4xf32>, vector<2x4xf32>, vector<2x4xf32>, vector<2x4xf32> -> vector<2x36xf32>
    %c0_21 = arith.constant 0 : index
    %c0_22 = arith.constant 0 : index
    %35 = vector.load %arg3[%c0_21, %c0_22] : memref<36x128xf32, #tpu.memory_space<vmem>>, vector<36x128xf32>
    %cst_23 = arith.constant dense<0.000000e+00> : vector<2x128xf32>
    %36 = tpu.matmul %34, %35, %cst_23 {dimension_numbers = #tpu.dot_dimension_numbers<[1], [0], [0], [1], [0, 0, 1, 1], [], []>} : vector<2x36xf32>, vector<36x128xf32>, vector<2x128xf32> -> vector<2x128xf32>
    %c0_24 = arith.constant 0 : index
    %c0_25 = arith.constant 0 : index
    %37 = vector.load %arg4[%c0_24, %c0_25] : memref<1x128xf32, #tpu.memory_space<vmem>>, vector<1x128xf32>
    %38 = vector.broadcast %37 : vector<1x128xf32> to vector<2x128xf32>
    %39 = arith.addf %36, %38 : vector<2x128xf32>
    %40 = tpu.iota {dimensions = array<i32: 1>} : vector<2x128xi32>
    %c5_i32 = arith.constant 5 : i32
    %41 = vector.broadcast %c5_i32 : i32 to vector<2x128xi32>
    %42 = arith.cmpi eq, %40, %41 : vector<2x128xi32>
    %43 = arith.negf %39 : vector<2x128xf32>
    %44 = math.exp %43 : vector<2x128xf32>
    %cst_26 = arith.constant 1.000000e+00 : f32
    %45 = vector.broadcast %cst_26 : f32 to vector<2x128xf32>
    %46 = arith.addf %45, %44 : vector<2x128xf32>
    %47 = arith.divf %45, %46 : vector<2x128xf32>
    %48 = arith.select %42, %47, %39 : vector<2x128xi1>, vector<2x128xf32>
    %c0_27 = arith.constant 0 : index
    %c0_28 = arith.constant 0 : index
    %49 = vector.load %arg5[%c0_27, %c0_28] : memref<2x128xf32, #tpu.memory_space<vmem>>, vector<2x128xf32>
    tpu.vector_store %arg5[%c0_27, %c0_28], %48 {strides = array<i32>} : memref<2x128xf32, #tpu.memory_space<vmem>>, vector<2x128xf32>,
    return
  }
  func.func @transform_0(%arg0: i32) -> (i32, i32, i32) {
    %c0_i32 = arith.constant 0 : i32
    %c0_i32_0 = arith.constant 0 : i32
    %c0_i32_1 = arith.constant 0 : i32
    return %arg0, %c0_i32, %c0_i32_0 : i32, i32, i32
  }
  func.func @transform_1(%arg0: i32) -> (i32, i32, i32) {
    %c0_i32 = arith.constant 0 : i32
    %c0_i32_0 = arith.constant 0 : i32
    %c0_i32_1 = arith.constant 0 : i32
    return %arg0, %c0_i32, %c0_i32_0 : i32, i32, i32
  }
  func.func @transform_2(%arg0: i32) -> (i32, i32) {
    %c0_i32 = arith.constant 0 : i32
    %c0_i32_0 = arith.constant 0 : i32
    %c0_i32_1 = arith.constant 0 : i32
    return %c0_i32, %c0_i32_0 : i32, i32
  }
  func.func @transform_3(%arg0: i32) -> (i32, i32) {
    %c0_i32 = arith.constant 0 : i32
    %c0_i32_0 = arith.constant 0 : i32
    %c0_i32_1 = arith.constant 0 : i32
    return %c0_i32, %c0_i32_0 : i32, i32
  }
  func.func @transform_4(%arg0: i32) -> (i32, i32) {
    %c0_i32 = arith.constant 0 : i32
    %c0_i32_0 = arith.constant 0 : i32
    return %arg0, %c0_i32 : i32, i32
  }
}

</mosaic_0001>

<bundles_post_ra>
// kernel: tpu_custom_call.1
= control target key start
LH: loop header
LB: loop body
LE: loop exit
PB: predicated region body
PF: predicated region fallthrough
CT: control target
= control target key end

     0   :  { %9 = vsyncpa [#allocation3], 0  ;;  %s763_s0 = inlined_call_operand.hbm [shape: bf16[2,16,64], index: 0, kind: input, shape index: {}]   ;;  %s764_s1 = inlined_call_operand.hbm [shape: bf16[2,8,8], index: 1, kind: input, shape index: {}]   ;;  %s765_s2 = inlined_call_operand.hbm [shape: f32[36,128], index: 2, kind: input, shape index: {}]   ;;  %s766_s3 = inlined_call_operand.vmem [shape: f32[1,128], index: 3, kind: input, shape index: {}]   ;;  %s767_s4 = inlined_call_operand.hbm [shape: f32[2,128], index: 4, kind: output, shape index: {}]  }
   0x1   :  { %10 = vsyncpa [#allocation6], 0 }
   0x2   :  { %11 = vsyncpa [#allocation4], 0  ;;  %s584_s15 = smov [#allocation5]   ;;  %s585_s17 = smov [#allocation2]  }
   0x3   :  { %s29_s16 = sshll.u32 %s584_s15, 4  ;;  %s17_s18 = sshll.u32 %s585_s17, 4  ;;  %s30_s16 = int_to_ptr.vmem [resolvable:$true] %s29_s16  ;;  %s623_s18 = int_to_ptr.vmem [resolvable:$true] %s17_s18 }
   0x4   :  { %s490_s21 = scalar_lea.hbm %s764_s1, 128 }
   0x5   :  { %p491_p0 = scmp.ne.s32.totalorder %s764_s1, %s490_s21  ;;  %p494_p1 = scmp.lt.u32.totalorder %s490_s21, %s764_s1 }
   0x7   :  { %p496_p2 = pnand %p494_p1, %p491_p0 }
   0x9   :  { %499 = shalt.err (!%p496_p2)
}
   0xa   :  { %s500_s26 = scalar_lea.vmem %s30_s16, 128  ;;  %p505_p4 = scmp.lt.s32.totalorder %s30_s16, %s30_s16 }
   0xb   :  { %p501_p3 = scmp.ne.s32.totalorder %s30_s16, %s500_s26  ;;  %p506_p5 = scmp.lt.s32.totalorder %s500_s26, %s500_s26 }
   0xd   :  { %p507_p6 = por %p506_p5, %p505_p4 }
   0xf   :  { %p508_p7 = pnand %p507_p6, %p501_p3 }
  0x11   :  { %511 = shalt.err (!%p508_p7)
}
  0x12   :  { %s586_s27 = smov 64   ;;  %s587_s28 = smov 4  }
  0x13   :  { %35 = dma.hbm_to_vmem [thread:$0]  %s764_s1, 128, %s30_s16, [#allocation6], %s586_s27, %s586_s27, %s587_s28  }
  0x14   :  { %s512_s7 = scalar_lea.hbm %s763_s0, 256 }
  0x15   :  { %p513_p8 = scmp.ne.s32.totalorder %s763_s0, %s512_s7  ;;  %p516_p9 = scmp.lt.u32.totalorder %s512_s7, %s763_s0 }
  0x17   :  { %p518_p10 = pnand %p516_p9, %p513_p8 }
  0x19   :  { %521 = shalt.err (!%p518_p10)
}
  0x1a   :  { %s522_s12 = scalar_lea.vmem %s623_s18, 256  ;;  %p527_p12 = scmp.lt.s32.totalorder %s623_s18, %s623_s18 }
  0x1b   :  { %p523_p11 = scmp.ne.s32.totalorder %s623_s18, %s522_s12  ;;  %p528_p13 = scmp.lt.s32.totalorder %s522_s12, %s522_s12 }
  0x1d   :  { %p529_p0 = por %p528_p13, %p527_p12 }
  0x1f   :  { %p530_p1 = pnand %p529_p0, %p523_p11 }
  0x21   :  { %533 = shalt.err (!%p530_p1)
}
  0x22   :  { %23 = dma.hbm_to_vmem [thread:$0]  %s763_s0, 256, %s623_s18, [#allocation3], %s586_s27, %s586_s27, %s587_s28  }
  0x23   :  { %s588_s14 = smov [#allocation7]   ;;  %s534_s19 = scalar_lea.hbm %s765_s2, 640 }
  0x24   :  { %s41_s15 = sshll.u32 %s588_s14, 4  ;;  %p535_p2 = scmp.ne.s32.totalorder %s765_s2, %s534_s19  ;;  %s42_s15 = int_to_ptr.vmem [resolvable:$true] %s41_s15 }
  0x25   :  { %p538_p3 = scmp.lt.u32.totalorder %s534_s19, %s765_s2 }
  0x27   :  { %p540_p4 = pnand %p538_p3, %p535_p2 }
  0x29   :  { %543 = shalt.err (!%p540_p4)
}
  0x2a   :  { %s544_s24 = scalar_lea.vmem %s42_s15, 640  ;;  %p549_p6 = scmp.lt.s32.totalorder %s42_s15, %s42_s15 }
  0x2b   :  { %p545_p5 = scmp.ne.s32.totalorder %s42_s15, %s544_s24  ;;  %p550_p7 = scmp.lt.s32.totalorder %s544_s24, %s544_s24 }
  0x2d   :  { %p551_p8 = por %p550_p7, %p549_p6 }
  0x2f   :  { %p552_p9 = pnand %p551_p8, %p545_p5 }
  0x31   :  { %555 = shalt.err (!%p552_p9)
}
  0x32   :  { %s589_s0 = smov 128   ;;  %s590_s18 = smov 8  }
  0x33   :  { %47 = dma.hbm_to_vmem [thread:$0]  %s765_s2, 640, %s42_s15, [#allocation6], %s589_s0, %s589_s0, %s590_s18  }
  0x34   :  { %578 = dma.done.wait [#allocation3], 256  }
  0x35   :  { %579 = vsyncadd [#allocation3], 4294967040 }
  0x36   :  { %580 = dma.done.wait [#allocation6], 768  }
  0x37   :  { %581 = vsyncadd [#allocation6], 4294966528  ;;  %v106_v0 = vld [vmem:[#allocation2 + $0x4] sm:$0xc]  ;;  %v107_v1 = vld [vmem:[#allocation2 + $0xc] sm:$0xc]  ;;  %v177_v54 = vlaneseq }
  0x38   :  { %v666_v2 = vld [vmem:[#allocation5] sm:$0xc]  ;;  %v108_v3 = vunpack.c.l.bf16 %v106_v0  ;;  %v109_v4 = vunpack.c.l.bf16 %v107_v1  ;;  %vm74_vm0 = vcmask 523268   ;;  %vm124_vm1 = vcmask 64516   ;;  %v669_v6 = vld [vmem:[#allocation5 + $0x4] sm:$0xc] }
  0x39   :  { %v143_v5 = vunpack.c.l.bf16 %v666_v2  ;;  %s591_s2 = smov 72   ;;  %v144_v10 = vunpack.c.l.bf16 %v669_v6  ;;  %v131_v11 = vld [vmem:[#allocation5] sm:$0x3]  ;;  %vm99_vm2 = vcmask 60416   ;;  %v132_v14 = vld [vmem:[#allocation5 + $0x4] sm:$0x3] }
  0x3a   :  { %v473_v7 = vpack.i.bf16 %v109_v4, %v108_v3  ;;  %v113_v8 = vsel %vm74_vm0, %v109_v4, 0.0  ;;  %v133_v13 = vunpack.c.l.bf16 %v131_v11  ;;  %v134_v16 = vunpack.c.l.bf16 %v132_v14  ;;  %v81_v19 = vld [vmem:[#allocation2 + $0x4] sm:$0x3]  ;;  %v82_v20 = vld [vmem:[#allocation2 + $0xc] sm:$0x3]  ;;  %s597_s29 = smov [#allocation8]  }
  0x3b   :  { %114 = vadd.xlane.f32.xlu1 %v113_v8  ;;  %v145_v9 = vsel %vm124_vm1, %v143_v5, 0.0  ;;  %v148_v12 = vsel %vm124_vm1, %v144_v10, 0.0  ;;  %v110_v18 = vsel %vm74_vm0, %v108_v3, 0.0  ;;  %v83_v21 = vunpack.c.l.bf16 %v81_v19  ;;  %v70_v26 = vld [vmem:[#allocation2] sm:$0xc]  ;;  %s420_s30 = sshll.u32 %s597_s29, 4  ;;  %s421_s30 = int_to_ptr.vmem [resolvable:$true] %s420_s30 }
  0x3c   :  { %474 = vrot.lane.b32.xlu0 %v473_v7, %s591_s2  ;;  %v135_v15 = vsel %vm99_vm2, %v133_v13, 0.0  ;;  %v138_v17 = vsel %vm99_vm2, %v134_v16, 0.0  ;;  %v84_v22 = vunpack.c.l.bf16 %v82_v20  ;;  %v72_v29 = vunpack.c.l.bf16 %v70_v26  ;;  %v71_v30 = vld [vmem:[#allocation2 + $0x8] sm:$0xc]  ;;  %v59_v36 = vld [vmem:[#allocation2] sm:$0x3]  ;;  %p561_p11 = scmp.lt.s32.totalorder %s421_s30, %s421_s30 }
  0x3d   :  { %v73_v33 = vunpack.c.l.bf16 %v71_v30  ;;  %vm63_vm3 = vcmask 519168   ;;  %v61_v38 = vunpack.c.l.bf16 %v59_v36  ;;  %v60_v39 = vld [vmem:[#allocation2 + $0x8] sm:$0x3]  ;;  %v592_v40 = vmov 7   ;;  %s556_s5 = scalar_lea.vmem %s421_s30, 32 }
  0x3e   :  { %v478_v23 = vpack.i.bf16 %v84_v22, %v83_v21  ;;  %v75_v32 = vsel %vm74_vm0, %v72_v29, 0.0  ;;  %v85_v35 = vsel %vm63_vm3, %v83_v21, 0.0  ;;  %v88_v37 = vsel %vm63_vm3, %v84_v22, 0.0  ;;  %483 = vset.pattern.permute.xlu0 %v592_v40  ;;  %484 = vset.pattern.permute.xlu1 %v592_v40  ;;  %v314_v21 = vld [vmem:[#allocation7] sm:$0xff]  ;;  %v315_v22 = vld [vmem:[#allocation7 + $0x8] sm:$0xff]  ;;  %p557_p10 = scmp.ne.s32.totalorder %s421_s30, %s556_s5  ;;  %p562_p12 = scmp.lt.s32.totalorder %s556_s5, %s556_s5 }
  0x3f   :  { %146 = vadd.xlane.f32.xlu1 %v145_v9  ;;  %v78_v34 = vsel %vm74_vm0, %v73_v33, 0.0  ;;  %v64_v41 = vsel %vm63_vm3, %v61_v38, 0.0  ;;  %v62_v42 = vunpack.c.l.bf16 %v60_v39  ;;  %v696_v56 = vand.u32 127, %v177_v54 }
  0x40   :  { %v699_v59 = vshrl.u32 %v177_v54, 7  ;;  %vm188_vm4 = vcmask 1045509   ;;  %v594_v6 = vmov 0.0|0.0   ;;  %vm595_vm5 = vmmov 0   ;;  %p563_p13 = por %p562_p12, %p561_p11 }
  0x41   :  { %v67_v43 = vsel %vm63_vm3, %v62_v42, 0.0  ;;  %v193_v57 = vadd.s32 4294967292, %v696_v56  ;;  %v237_v3 = vadd.s32 4294967280, %v696_v56  ;;  %453 = vmatprep.subr.bf16.mxu0 %v594_v6  ;;  %v596_v26 = vmov 0.0  }
  0x42   :  { %450 = vmatprep.mubr.msk.f32.mxu0 %vm595_vm5, %v596_v26  ;;  %vm331_vm6 = vcmask 1043456   ;;  %v275_v39 = vadd.s32 4294967268, %v696_v56  ;;  %v224_v40 = vadd.s32 4294967288, %v696_v56  ;;  %vm298_vm7 = vcmask 31744   ;;  %p564_p0 = pnand %p563_p13, %p557_p10 }
  0x43   :  { %149 = vadd.xlane.f32.xlu1 %v148_v12  ;;  %v196_v61 = vsub.s32 %v193_v57, %v699_v59  ;;  %v713_v13 = vsub.s32 %v237_v3, %v699_v59  ;;  %vm300_vm8 = vcmask 64512   ;;  %vm302_vm9 = vcmask 97280  }
  0x44   :  { %vm304_vm10 = vcmask 130048   ;;  %vm306_vm11 = vcmask 162816   ;;  %vm308_vm12 = vcmask 195584   ;;  %vm310_vm13 = vcmask 228352  }
  0x45   :  { %vm312_vm14 = vcmask 261120   ;;  %vm328_vm15 = vcmask 293888   ;;  %vm405_vm0 = vcmp.eq.s32.totalorder %v696_v56, 5 }
  0x47   :  { %136 = vadd.xlane.f32.xlu1 %v135_v15  ;;  %v593_v15 = vmov 0  }
  0x4b   :  { %139 = vadd.xlane.f32.xlu1 %v138_v17 }
  0x5b   :  { %111 = vadd.xlane.f32.xlu0 %v110_v18 }
  0x71   :  { %479 = vrot.lane.b32.xlu0 %v478_v23, %s591_s2  ;;  %v454_v23 = vpack.c.bf16 %v315_v22, %v314_v21 }
  0x73   :  { %455 = vmatpush3.bf16.msra.mxu0 %v454_v23 }
  0x74   :  { %456 = vmatprep.subr.bf16.mxu0 %v594_v6 }
  0xae   :  { %v475_v24 = vpop.permute.xlu0 %474 }
  0xaf   :  { %v476_v25 = vunpack.i.l.bf16 %v475_v24  ;;  %v477_v27 = vunpack.i.h.bf16 %v475_v24  ;;  %v317_v24 = vld [vmem:[#allocation7 + $0x18] sm:$0xff] }
  0xb1   :  { %v125_v28 = vsel %vm124_vm1, %v476_v25, 0.0  ;;  %v128_v31 = vsel %vm124_vm1, %v477_v27, 0.0  ;;  %v318_v27 = vld [vmem:[#allocation7 + $0x20] sm:$0xf] }
  0xb2   :  { %126 = vadd.xlane.f32.xlu1 %v125_v28 }
  0xb6   :  { %129 = vadd.xlane.f32.xlu1 %v128_v31 }
  0xba   :  { %76 = vadd.xlane.f32.xlu1 %v75_v32 }
  0xbe   :  { %79 = vadd.xlane.f32.xlu1 %v78_v34  ;;  %v179_v34 = vadd.s32 4, %v696_v56 }
  0xc0   :  { %v182_v38 = vsub.s32 %v179_v34, %v699_v59 }
  0xc2   :  { %86 = vadd.xlane.f32.xlu1 %v85_v35 }
  0xc6   :  { %89 = vadd.xlane.f32.xlu1 %v88_v37 }
  0xc8   :  { %v690_v50 = vpop.xlane.xlu1 %114 }
  0xca   :  { %65 = vadd.xlane.f32.xlu1 %v64_v41  ;;  %v262_v41 = vadd.s32 4294967276, %v696_v56 }
  0xcc   :  { %v692_v51 = vpop.xlane.xlu1 %146  ;;  %v265_v54 = vsub.s32 %v262_v41, %v699_v59 }
  0xce   :  { %68 = vadd.xlane.f32.xlu1 %v67_v43 }
  0xd0   :  { %v694_v52 = vpop.xlane.xlu1 %149 }
  0xd1   :  { %v168_v57 = vsub.f32 %v690_v50, %v694_v52 }
  0xd4   :  { %v137_v53 = vpop.xlane.xlu1 %136 }
  0xd5   :  { %v161_v4 = vrot.slane %v137_v53, 4  ;;  %v227_v53 = vsub.s32 %v224_v40, %v699_v59 }
  0xd8   :  { %v140_v55 = vpop.xlane.xlu1 %139 }
  0xe8   :  { %v686_v44 = vpop.xlane.xlu0 %111 }
  0xec   :  { %v480_v45 = vpop.permute.xlu0 %479 }
  0xed   :  { %v482_v46 = vunpack.i.h.bf16 %v480_v45  ;;  %v481_v47 = vunpack.i.l.bf16 %v480_v45 }
  0xef   :  { %v100_v48 = vsel %vm99_vm2, %v481_v47, 0.0  ;;  %v103_v49 = vsel %vm99_vm2, %v482_v46, 0.0 }
  0xf0   :  { %101 = vadd.xlane.f32.xlu1 %v100_v48 }
  0xf4   :  { %104 = vadd.xlane.f32.xlu1 %v103_v49  ;;  %v278_v49 = vsub.s32 %v275_v39, %v699_v59 }
 0x13f   :  { %v127_v58 = vpop.xlane.xlu1 %126 }
 0x140   :  { %v151_v60 = vsub.f32 %v686_v44, %v127_v58 }
 0x142   :  { %v153_v62 = vsub.f32 %v151_v60, %v692_v51  ;;  %v209_v7 = vrot.slane %v151_v60, %v196_v61 }
 0x143   :  { %v130_v63 = vpop.xlane.xlu1 %129 }
 0x144   :  { %v152_v0 = vsub.f32 %v690_v50, %v130_v63  ;;  %v155_v1 = vadd.f32 %v153_v62, %v143_v5  ;;  %v162_v5 = vrot.slane %v140_v55, 4  ;;  %v167_v55 = vsub.f32 %v686_v44, %v692_v51 }
 0x146   :  { %v154_v8 = vsub.f32 %v152_v0, %v694_v52  ;;  %v213_v9 = vrot.slane %v152_v0, %v196_v61  ;;  %172 = vperm.xlu0 %483, %v155_v1   ;;  %v295_v1 = vrot.slane %v690_v50, %v278_v49  ;;  %v266_v51 = vrot.slane %v167_v55, %v265_v54 }
 0x147   :  { %v77_v11 = vpop.xlane.xlu1 %76 }
 0x148   :  { %v710_v12 = vsel %vm188_vm4, %v213_v9, %v209_v7  ;;  %v165_v14 = vsub.f32 %v77_v11, %v161_v4  ;;  %v156_v2 = vadd.f32 %v154_v8, %v144_v10  ;;  %v253_v17 = vrot.slane %v77_v11, %v713_v13  ;;  %v316_v10 = vld [vmem:[#allocation7 + $0x10] sm:$0xff] }
 0x149   :  { %v457_v25 = vpack.c.bf16 %v317_v24, %v316_v10  ;;  %v270_v4 = vrot.slane %v168_v57, %v265_v54  ;;  %v291_v11 = vrot.slane %v686_v44, %v278_v49 }
 0x14a   :  { %485 = vset.pattern.permute.xlu0 %v593_v15  ;;  %175 = vperm.xlu1 %484, %v156_v2  }
 0x14b   :  { %219 = vperm.xlu0 %485, %v165_v14   ;;  %v80_v16 = vpop.xlane.xlu1 %79  ;;  %458 = vmatpush3.bf16.msra.mxu0 %v457_v25  ;;  %v271_v2 = vsel %vm188_vm4, %v270_v4, %v266_v51 }
 0x14c   :  { %v166_v18 = vsub.f32 %v80_v16, %v162_v5  ;;  %v257_v19 = vrot.slane %v80_v16, %v713_v13  ;;  %448 = vmatprep.subr.mxu0 %v596_v26 }
 0x14e   :  { %v720_v20 = vsel %vm188_vm4, %v257_v19, %v253_v17  ;;  %v296_v17 = vsel %vm188_vm4, %v295_v1, %v291_v11  ;;  %v430_v19 = vld [vmem:[%s766_s3] ss:$0 sm:$0xff] }
 0x14f   :  { %222 = vperm.xlu0 %485, %v166_v18   ;;  %449 = vmatpush3.msk.msra.mxu0 %vm331_vm6, %v318_v27  ;;  %v87_v28 = vpop.xlane.xlu1 %86 }
 0x150   :  { %v279_v52 = vrot.slane %v87_v28, %v278_v49 }
 0x153   :  { %v90_v29 = vpop.xlane.xlu1 %89 }
 0x154   :  { %v283_v7 = vrot.slane %v90_v29, %v278_v49 }
 0x156   :  { %v284_v15 = vsel %vm188_vm4, %v283_v7, %v279_v52 }
 0x157   :  { %v66_v30 = vpop.xlane.xlu1 %65 }
 0x15b   :  { %v69_v31 = vpop.xlane.xlu1 %68 }
 0x15c   :  { %v245_v62 = vrot.slane %v69_v31, %v713_v13 }
 0x17d   :  { %v102_v32 = vpop.xlane.xlu1 %101 }
 0x17e   :  { %v157_v35 = vsub.f32 %v87_v28, %v102_v32 }
 0x180   :  { %v197_v42 = vrot.slane %v157_v35, %v196_v61 }
 0x181   :  { %v105_v33 = vpop.xlane.xlu1 %104 }
 0x182   :  { %v158_v36 = vsub.f32 %v90_v29, %v105_v33 }
 0x184   :  { %v201_v43 = vrot.slane %v158_v36, %v196_v61  ;;  %v241_v61 = vrot.slane %v66_v30, %v713_v13 }
 0x186   :  { %v202_v60 = vsel %vm188_vm4, %v201_v43, %v197_v42  ;;  %v246_v13 = vsel %vm188_vm4, %v245_v62, %v241_v61 }
 0x1c5   :  { %v173_v37 = vpop.permute.xlu0 %172 }
 0x1c6   :  { %v183_v46 = vrot.slane %v173_v37, %v182_v38 }
 0x1c9   :  { %v176_v45 = vpop.permute.xlu1 %175 }
 0x1ca   :  { %v187_v47 = vrot.slane %v176_v45, %v182_v38  ;;  %v220_v48 = vpop.permute.xlu0 %219 }
 0x1cb   :  { %v228_v59 = vrot.slane %v220_v48, %v227_v53 }
 0x1cc   :  { %v189_v58 = vsel %vm188_vm4, %v187_v47, %v183_v46 }
 0x1cd   :  { %v299_v63 = vsel %vm298_vm7, %v189_v58, %v202_v60 }
 0x1ce   :  { %v223_v0 = vpop.permute.xlu0 %222  ;;  %v301_v9 = vsel %vm300_vm8, %v299_v63, %v710_v12 }
 0x1cf   :  { %v232_v3 = vrot.slane %v223_v0, %v227_v53 }
 0x1d1   :  { %v233_v8 = vsel %vm188_vm4, %v232_v3, %v228_v59 }
 0x1d2   :  { %v303_v14 = vsel %vm302_vm9, %v301_v9, %v233_v8 }
 0x1d3   :  { %v305_v50 = vsel %vm304_vm10, %v303_v14, %v246_v13 }
 0x1d4   :  { %v307_v5 = vsel %vm306_vm11, %v305_v50, %v720_v20 }
 0x1d5   :  { %v309_v16 = vsel %vm308_vm12, %v307_v5, %v271_v2 }
 0x1d6   :  { %v311_v18 = vsel %vm310_vm13, %v309_v16, %v284_v15 }
 0x1d7   :  { %v313_v12 = vsel %vm312_vm14, %v311_v18, %v296_v17 }
 0x1d8   :  { %v327_v44 = vrot.slane %v313_v12, 4 }
 0x1da   :  { %451 = vmatmul.mubr.msk.f32.vlgmr.msra.gmra.mrb[0].mxu0 %vm328_vm15, %v327_v44 }
 0x2ad   :  { %v401_v21 = vpop.f32.mrb[0].mxu0 }
 0x2ae   :  { %v402_v22 = vadd.f32 %v430_v19, %v401_v21  ;;  %v452_v23 = vpop.f32.mrb[1].mxu0 }
 0x2b0   :  { %v433_v6 = vmul.f32 -1.442695, %v402_v22 }
 0x2b2   :  { %486 = vpow2.f32 %v433_v6 }
 0x2bc   :  { %v487_v20 = vpop.eup %486 }
 0x2bd   :  { %v409_v10 = vadd.f32 1.0, %v487_v20 }
 0x2bf   :  { %488 = vrcp.f32 %v409_v10 }
 0x2c9   :  { %v489_v24 = vpop.eup %488 }
 0x2ca   :  { %v412_v25 = vsel %vm405_vm0, %v489_v24, %v402_v22 }
 0x2cb   :  { %413 = vst [vmem:[#allocation8] sm:$0x3] %v412_v25 }
 0x2cc   :  { %567 = shalt.err (!%p564_p0)
}
 0x2cd   :  { %s568_s7 = scalar_lea.hbm %s767_s4, 32 }
 0x2ce   :  { %p569_p1 = scmp.ne.s32.totalorder %s767_s4, %s568_s7  ;;  %p572_p2 = scmp.lt.u32.totalorder %s568_s7, %s767_s4 }
 0x2d0   :  { %p574_p3 = pnand %p572_p2, %p569_p1 }
 0x2d2   :  { %577 = shalt.err (!%p574_p3)
}
 0x2d3   :  { %423 = dma.vmem_to_hbm [thread:$0]  %s421_s30, 32, %s767_s4, [#allocation4]  }
 0x2d4   :  { %582 = dma.done.wait [#allocation4], 32  }
 0x2d5   :  { %583 = vsyncadd [#allocation4], 4294967264 }
 0x2d6   :  { %427 = vsyncpa [#allocation3], 1 }
 0x2d7   :  { %428 = vsyncpa [#allocation6], 1 }
 0x2d8   :  { %429 = vsyncpa [#allocation4], 1 }

</bundles_post_ra>
